<compile_context>
chip_gen: v6e
topology: v6e:2x2x1
jax: 0.10.0
libtpu: 0.0.40
codegen_flags: <defaults>
</compile_context>

<pallas_src>
import math

import jax
import jax.numpy as jnp
from jax.experimental import pallas as pl
from jax.experimental.pallas import tpu as pltpu


def _round_up(x, m):
    return ((x + m - 1) // m) * m


# ---------------------------------------------------------------------------
# Row-tile (TH = output rows per grid step) selection.
# ---------------------------------------------------------------------------
def _pick_row_tile(n, hout, w, cin, *, max_pin_cap=2048, in_block_budget=8 << 20):
    """Pick TH such that
      * th*w % 256 == 0 (unless th == hout): input block last dim %512 and
        output block last dim %128 -> legal BlockSpec tiling + unmasked vst;
      * 2*th*w <= ~min(2048, 4*Cin): keeps the dense pooling-matrix matmul
        (MXU M-dim utilisation is only Cin/256) and its VMEM streaming hidden
        under the HBM DMA on v5e/v6e/v7x;
      * input block bytes <= 8 MiB (review target; with the pixel cap this
        also fits v7x's 64 MiB VMEM comfortably, double-buffered);
      * prefer divisors of hout; otherwise cdiv grid + in-kernel tail mask.
    """
    max_pin = min(max_pin_cap, max(512, _round_up(4 * cin, 512)))
    g = 256 // math.gcd(256, w)            # row granularity for lane-dense blocks
    if g >= hout:
        return hout                        # single full-extent block: always legal
    cap = min(hout,
              max(1, max_pin // (2 * w)),
              max(1, in_block_budget // (2 * w * cin * 4)))
    th = max(g, (cap // g) * g)
    if th >= hout:
        th = hout
        if n == 1 and hout >= 2 * g:       # v7x: give both TCs / pipeline >= 2 blocks
            half = _round_up((hout + 1) // 2, g)
            if g <= half < hout:
                th = half
        return th
    cand = th                              # prefer an exact divisor (no tail tile)
    while cand >= g and 2 * cand >= th:
        if hout % cand == 0:
            return cand
        cand -= g
    return th                              # non-divisor: cdiv grid + masked tail


# ---------------------------------------------------------------------------
# Fused kernel: [flat pixels] --pool matmul--> [pooled pixels] --conv matmul-->
#               [Cout x pooled pixels] --+bias--> output block.
# ---------------------------------------------------------------------------
def _make_kernel(needs_mask, pin, paired_pix):
    def kernel(x_ref, s_ref, w_ref, b_ref, o_ref):
        # x_ref: (1, Cin, Pin)  f32   flat NCHW input pixels (2*TH rows x W)
        # s_ref: (Pin, Pout)    bf16  constant 2x2 avg-pool selection matrix
        # w_ref: (Cout, Cin)    bf16  conv weight with BN scale folded in
        # b_ref: (Cout, 1)      f32   (conv_b - mean)*scale + beta
        # o_ref: (1, Cout, Pout) f32  flat NCHW output pixels (TH rows x Wout)
        v = x_ref[0]                                          # (Cin, Pin) f32
        if needs_mask:
            # Tail tile: zero any lanes past the valid (row-paired) region so
            # stale-VMEM garbage can never leak through the pooling matmul.
            j = pl.program_id(1)
            valid = paired_pix - j * pin
            lane = jax.lax.broadcasted_iota(jnp.int32, v.shape, 1)
            v = jnp.where(lane < valid, v, 0.0)

        # 2x2 average pool as an MXU matmul (bf16 operands, f32 accumulation).
        pooled = jnp.dot(v.astype(jnp.bfloat16), s_ref[...],
                         preferred_element_type=jnp.float32)  # (Cin, Pout)

        # 1x1 conv (with BN scale folded into the weight), f32 accumulation.
        acc = jnp.dot(w_ref[...], pooled.astype(jnp.bfloat16),
                      preferred_element_type=jnp.float32)     # (Cout, Pout)

        # Epilogue: per-channel f32 bias only.
        o_ref[0] = acc + b_ref[...]
    return kernel


# ---------------------------------------------------------------------------
# Wrapper: zero-copy flat NCHW views + parameter folding + pallas_call.
# ---------------------------------------------------------------------------
def transition_forward(x_nchw, params, eps=1e-5):
    conv_w = params["conv_w"]          # (Cout, Cin, 1, 1)  PyTorch OIHW
    conv_b = params["conv_b"]          # (Cout,)
    gamma = params["gamma"]
    beta = params["beta"]
    mean = params["running_mean"]
    var = params["running_var"]

    n, cin, h, w = x_nchw.shape
    cout = conv_w.shape[0]
    hout, wout = h // 2, w // 2        # PyTorch AvgPool2d(2,2) truncates odd H/W

    th = _pick_row_tile(n, hout, w, cin)
    pin, pout = 2 * th * w, th * wout
    grid = (n, pl.cdiv(hout, th))
    needs_mask = (hout % th) != 0

    # Zero-copy flat NCHW view of the input; no transposes anywhere.
    xf = x_nchw.reshape(n, cin, h * w)

    # Fold the BatchNorm (inference) scale into the bf16 conv weight; keep the
    # additive term in f32 for the epilogue.
    scale = gamma / jnp.sqrt(var + eps)
    w2 = (conv_w.reshape(cout, cin) * scale[:, None]).astype(jnp.bfloat16)
    bias = ((conv_b - mean) * scale + beta).astype(jnp.float32).reshape(cout, 1)

    # Constant (block-relative) 2x2 average-pool selection matrix: entry 0.25
    # where flat input pixel p feeds pooled pixel q.  Odd trailing columns map
    # to no output column (PyTorch truncation semantics).
    p = jnp.arange(pin, dtype=jnp.int32)
    col = p % w
    q = (p // (2 * w)) * wout + col // 2
    eq = q[:, None] == jnp.arange(pout, dtype=jnp.int32)[None, :]
    eq = jnp.where((col < 2 * wout)[:, None], eq, False)
    s = (eq.astype(jnp.float32) * 0.25).astype(jnp.bfloat16)

    kernel = _make_kernel(needs_mask, pin, 2 * hout * w)

    # Explicit VMEM limit: double-buffered in/out blocks + resident operands +
    # in-kernel temporaries, with headroom; capped well under v7x's 64 MiB.
    vmem_need = (2 * cin * pin * 4 + 2 * cout * pout * 4 + 2 * pin * pout * 2
                 + 2 * (cout * cin * 2 + cout * 4)
                 + cin * pin * 2 + cin * pout * 6 + cout * pout * 4)
    vmem_limit = int(min(48 << 20, max(int(vmem_need * 1.5) + (2 << 20), 32 << 20)))

    out_flat = pl.pallas_call(
        kernel,
        out_shape=jax.ShapeDtypeStruct((n, cout, hout * wout), jnp.float32),
        grid_spec=pltpu.PrefetchScalarGridSpec(
            num_scalar_prefetch=0,
            grid=grid,
            in_specs=[
                pl.BlockSpec((1, cin, pin), lambda i, j: (i, 0, j)),
                pl.BlockSpec((pin, pout), lambda i, j: (0, 0)),
                pl.BlockSpec((cout, cin), lambda i, j: (0, 0)),
                pl.BlockSpec((cout, 1), lambda i, j: (0, 0)),
            ],
            out_specs=pl.BlockSpec((1, cout, pout), lambda i, j: (i, 0, j)),
        ),
        compiler_params=pltpu.CompilerParams(
            dimension_semantics=("parallel", "parallel"),
            vmem_limit_bytes=vmem_limit),
    )(xf, s, w2, bias)

    # Zero-copy reshape back to NCHW.
    return out_flat.reshape(n, cout, hout, wout)


# ---------------------------------------------------------------------------
# Pure-JAX reference (conv -> bn(eval) -> avgpool), PyTorch semantics.
# ---------------------------------------------------------------------------
def transition_reference(x, params, eps=1e-5):
    w = params["conv_w"][:, :, 0, 0]                     # (Cout, Cin)
    y = jnp.einsum("nchw,oc->nohw", x, w) + params["conv_b"][None, :, None, None]
    inv = 1.0 / jnp.sqrt(params["running_var"] + eps)
    y = (y - params["running_mean"][None, :, None, None]) * inv[None, :, None, None]
    y = y * params["gamma"][None, :, None, None] + params["beta"][None, :, None, None]
    n, c, h, w_ = y.shape
    y = y[:, :, : (h // 2) * 2, : (w_ // 2) * 2]
    y = y.reshape(n, c, h // 2, 2, w_ // 2, 2).mean(axis=(3, 5))
    return y


# ---------------------------------------------------------------------------
# Deterministic demo.
# ---------------------------------------------------------------------------
if __name__ == "__main__":
    key = jax.random.PRNGKey(0)
    kx, kw, kb, kg, kbe, km, kv = jax.random.split(key, 7)

    N, Cin, H, W = 2, 4, 16, 16
    Cout = 8

    x = jax.random.normal(kx, (N, Cin, H, W), jnp.float32)
    params = dict(
        conv_w=0.05 * jax.random.normal(kw, (Cout, Cin, 1, 1), jnp.float32),
        conv_b=0.05 * jax.random.normal(kb, (Cout,), jnp.float32),
        gamma=1.0 + 0.1 * jax.random.normal(kg, (Cout,), jnp.float32),
        beta=0.1 * jax.random.normal(kbe, (Cout,), jnp.float32),
        running_mean=0.1 * jax.random.normal(km, (Cout,), jnp.float32),
        running_var=jax.random.uniform(kv, (Cout,), jnp.float32, 0.5, 1.5),
    )

    fwd = jax.jit(lambda xx: transition_forward(xx, params))
    y = fwd(x)
    jax.block_until_ready(y)

    assert y.shape == (N, Cout, H // 2, W // 2) and y.dtype == jnp.float32

    y_ref = transition_reference(x, params)
    max_err = float(jnp.max(jnp.abs(y - y_ref)))
    assert max_err < 3e-2, f"max abs error too large: {max_err}"

    print("KERNEL_OK")
</pallas_src>

<mosaic_0001>
module attributes {stable_mosaic.version = 11 : i64} {
  func.func @kernel(%arg0: i32, %arg1: i32, %arg2: memref<1x4x256xf32, #tpu.memory_space<vmem>>, %arg3: memref<256x64xbf16, #tpu.memory_space<vmem>>, %arg4: memref<8x4xbf16, #tpu.memory_space<vmem>>, %arg5: memref<8x1xf32, #tpu.memory_space<vmem>>, %arg6: memref<1x8x64xf32, #tpu.memory_space<vmem>>) attributes {dimension_semantics = [#tpu.dimension_semantics<parallel>, #tpu.dimension_semantics<parallel>], iteration_bounds = array<i64: 2, 1>, scalar_prefetch = 0 : i64, scratch_operands = 0 : i64, tpu.core_type = #tpu.core_type<tc>, window_params = [{transform_indices = @transform_0, window_bounds = array<i64: 1, 4, 256>}, {pipeline_mode = #tpu.pipeline_mode<synchronous>, transform_indices = @transform_1, window_bounds = array<i64: 256, 64>}, {pipeline_mode = #tpu.pipeline_mode<synchronous>, transform_indices = @transform_2, window_bounds = array<i64: 8, 4>}, {pipeline_mode = #tpu.pipeline_mode<synchronous>, transform_indices = @transform_3, window_bounds = array<i64: 8, 1>}, {transform_indices = @transform_4, window_bounds = array<i64: 1, 8, 64>}]} {
    %c0 = arith.constant 0 : index
    %c0_0 = arith.constant 0 : index
    %c0_1 = arith.constant 0 : index
    %0 = vector.load %arg2[%c0, %c0_0, %c0_1] : memref<1x4x256xf32, #tpu.memory_space<vmem>>, vector<1x4x256xf32>
    %1 = vector.shape_cast %0 : vector<1x4x256xf32> to vector<4x256xf32>
    %2 = arith.truncf %1 : vector<4x256xf32> to vector<4x256xbf16>
    %c0_2 = arith.constant 0 : index
    %c0_3 = arith.constant 0 : index
    %3 = vector.load %arg3[%c0_2, %c0_3] : memref<256x64xbf16, #tpu.memory_space<vmem>>, vector<256x64xbf16>
    %cst = arith.constant dense<0.000000e+00> : vector<4x64xf32>
    %4 = tpu.matmul %2, %3, %cst {dimension_numbers = #tpu.dot_dimension_numbers<[1], [0], [0], [1], [0, 0, 1, 1], [], []>} : vector<4x256xbf16>, vector<256x64xbf16>, vector<4x64xf32> -> vector<4x64xf32>
    %c0_4 = arith.constant 0 : index
    %c0_5 = arith.constant 0 : index
    %5 = vector.load %arg4[%c0_4, %c0_5] : memref<8x4xbf16, #tpu.memory_space<vmem>>, vector<8x4xbf16>
    %6 = arith.truncf %4 : vector<4x64xf32> to vector<4x64xbf16>
    %cst_6 = arith.constant dense<0.000000e+00> : vector<8x64xf32>
    %7 = tpu.matmul %5, %6, %cst_6 {dimension_numbers = #tpu.dot_dimension_numbers<[1], [0], [0], [1], [0, 0, 1, 1], [], []>} : vector<8x4xbf16>, vector<4x64xbf16>, vector<8x64xf32> -> vector<8x64xf32>
    %c0_7 = arith.constant 0 : index
    %c0_8 = arith.constant 0 : index
    %8 = vector.load %arg5[%c0_7, %c0_8] : memref<8x1xf32, #tpu.memory_space<vmem>>, vector<8x1xf32>
    %9 = vector.broadcast %8 : vector<8x1xf32> to vector<8x64xf32>
    %10 = arith.addf %7, %9 : vector<8x64xf32>
    %c0_9 = arith.constant 0 : index
    %c0_10 = arith.constant 0 : index
    %c0_11 = arith.constant 0 : index
    %11 = vector.load %arg6[%c0_9, %c0_10, %c0_11] : memref<1x8x64xf32, #tpu.memory_space<vmem>>, vector<1x8x64xf32>
    %12 = vector.shape_cast %11 : vector<1x8x64xf32> to vector<8x64xf32>
    %13 = vector.shape_cast %10 : vector<8x64xf32> to vector<1x8x64xf32>
    tpu.vector_store %arg6[%c0_9, %c0_10, %c0_11], %13 {strides = array<i32>} : memref<1x8x64xf32, #tpu.memory_space<vmem>>, vector<1x8x64xf32>,
    return
  }
  func.func @transform_0(%arg0: i32, %arg1: i32) -> (i32, i32, i32) {
    %c0_i32 = arith.constant 0 : i32
    %c0_i32_0 = arith.constant 0 : i32
    return %arg0, %c0_i32, %arg1 : i32, i32, i32
  }
  func.func @transform_1(%arg0: i32, %arg1: i32) -> (i32, i32) {
    %c0_i32 = arith.constant 0 : i32
    %c0_i32_0 = arith.constant 0 : i32
    %c0_i32_1 = arith.constant 0 : i32
    return %c0_i32, %c0_i32_0 : i32, i32
  }
  func.func @transform_2(%arg0: i32, %arg1: i32) -> (i32, i32) {
    %c0_i32 = arith.constant 0 : i32
    %c0_i32_0 = arith.constant 0 : i32
    %c0_i32_1 = arith.constant 0 : i32
    return %c0_i32, %c0_i32_0 : i32, i32
  }
  func.func @transform_3(%arg0: i32, %arg1: i32) -> (i32, i32) {
    %c0_i32 = arith.constant 0 : i32
    %c0_i32_0 = arith.constant 0 : i32
    %c0_i32_1 = arith.constant 0 : i32
    return %c0_i32, %c0_i32_0 : i32, i32
  }
  func.func @transform_4(%arg0: i32, %arg1: i32) -> (i32, i32, i32) {
    %c0_i32 = arith.constant 0 : i32
    %c0_i32_0 = arith.constant 0 : i32
    return %arg0, %c0_i32, %arg1 : i32, i32, i32
  }
}

</mosaic_0001>

<bundles_post_ra>
// kernel: _lambda_.1
= control target key start
LH: loop header
LB: loop body
LE: loop exit
PB: predicated region body
PF: predicated region fallthrough
CT: control target
= control target key end

     0   :  { %s697_s15 = smov 0   ;;  %s699_s16 = smov 0   ;;  %s791_s0 = inlined_call_operand.vmem [shape: f32[2,4,256], index: 0, kind: input, shape index: {}]   ;;  %s792_s1 = inlined_call_operand.vmem [shape: bf16[256,64], index: 1, kind: input, shape index: {}]   ;;  %s793_s2 = inlined_call_operand.vmem [shape: bf16[8,4], index: 2, kind: input, shape index: {}]   ;;  %s794_s3 = inlined_call_operand.vmem [shape: f32[8,1], index: 3, kind: input, shape index: {}]   ;;  %s795_s4 = inlined_call_operand.vmem [shape: f32[2,8,64], index: 4, kind: output, shape index: {}]  }
   0x1   :  { %s701_s17 = smov 0  }
   0x2 LB: > { %s26_s18 = sadd.s32 1, %s663_s16  ;;  %p546_p0 = scmp.ge.s32.totalorder %s667_s17, 1  ;;  %s667_s17 = sphi %s701_s17, %s14_s17   ;;  %s663_s16 = sphi %s699_s16, %s797_s16   ;;  %s659_s15 = sphi %s697_s15, %s796_s15  }
   0x3   : > { %p28_p1 = scmp.ge.s32.totalorder %s26_s18, 2  ;;  %p183_p2 = scmp.lt.s32.totalorder %s667_s17, 3 }
   0x5   : > { %s799_s18 = smov (%p28_p1, %s26_s18), 0  ;;  %p184_p3 = pnand %p546_p0, %p183_p2 }
   0x6   : > { %p216_p4 = scmp.lt.s32.totalorder (!%p184_p3), %s659_s15, 1 }
   0x7   : > { %187 = sbr.rel (%p184_p3) target bundleno = 447 (0x1bf), region = 36 }
   0xc   : > { %v628_v0 = vld [vmem:[%s792_s1 + $0x78] sm:$0xff]   ;;  %v630_v2 = vld [vmem:[%s792_s1 + $0x70] sm:$0xff]   ;;  %v632_v4 = vld [vmem:[%s792_s1 + $0x68] sm:$0xff]   ;;  %s801_s15 = smov (!%p216_p4, %s659_s15), 1  ;;  %v669_v20 = vmov 0.0   ;;  %vm670_vm0 = vmmov 0  }
   0xd   : > { %v629_v1 = vld [vmem:[%s792_s1 + $0x38] sm:$0xff]   ;;  %570 = vmatprep.subr.bf16.mxu0 %v628_v0  ;;  %v631_v3 = vld [vmem:[%s792_s1 + $0x30] sm:$0xff]   ;;  %v633_v5 = vld [vmem:[%s792_s1 + $0x28] sm:$0xff]   ;;  %s569_s7 = sshll.u32 %s801_s15, 3  ;;  %594 = vmatprep.subr.bf16.mxu1 %v669_v20  ;;  %v671_v22 = vmov 0   ;;  %vm419_vm1 = vcmask 1041408  }
   0xe   : > { %571 = vmatpush3.bf16.msra.mxu0 %v629_v1  ;;  %v634_v6 = vld [vmem:[%s792_s1 + $0x60] sm:$0xff]   ;;  %v636_v8 = vld [vmem:[%s792_s1 + $0x58] sm:$0xff]   ;;  %s223_s14 = scalar_lea.vmem %s791_s0, %s569_s7  ;;  %v638_v10 = vld [vmem:[%s792_s1 + $0x50] sm:$0xff]   ;;  %596 = vmatprep.mubr.msk.bf16.mxu1 %vm670_vm0, %v669_v20  ;;  %vm415_vm2 = vcmask 31744   ;;  %vm463_vm3 = vcmask 523264  }
   0xf   : > { %572 = vmatprep.subr.bf16.mxu0 %v630_v2  ;;  %v635_v7 = vld [vmem:[%s792_s1 + $0x20] sm:$0xff]   ;;  %v637_v9 = vld [vmem:[%s792_s1 + $0x18] sm:$0xff]   ;;  %v639_v13 = vld [vmem:[%s792_s1 + $0x10] sm:$0xff]   ;;  %627 = vset.pattern.permute.xlu0 %v671_v22 }
  0x10   : > { %v233_v11 = vld [vmem:[%s223_s14] sm:$0xff]  ;;  %v640_v15 = vld [vmem:[%s792_s1 + $0x48] sm:$0xff]   ;;  %s231_s14 = scalar_lea.vmem %s795_s4, %s569_s7 }
  0x11   : > { %v235_v12 = vcombine.high %v233_v11, %v233_v11  ;;  %v641_v16 = vld [vmem:[%s792_s1 + $0x8] sm:$0xff]   ;;  %v642_v17 = vld [vmem:[%s792_s1 + $0x40] sm:$0xff]   ;;  %v237_v19 = vpack.c.bf16 %v233_v11, %v233_v11 }
  0x12   : > { %573 = vmatpush3.bf16.msra.mxu0 %v631_v3  ;;  %v643_v18 = vld [vmem:[%s792_s1] sm:$0xff]  }
  0x13   : > { %574 = vmatprep.subr.bf16.mxu0 %v632_v4  ;;  %v238_v14 = vpack.c.bf16 %v235_v12, %v235_v12  ;;  %v409_v21 = vld [vmem:[%s794_s3] sm:$0xff] }
  0x14   : > { %412 = vperm.xlu0 %627, %v409_v21   ;;  %v407_v30 = vld [vmem:[%s793_s2] sm:$0xf] }
  0x15   : > { %399 = vmatprep.mubr.bf16.mxu0 %v238_v14 }
  0x16   : > { %575 = vmatpush3.bf16.msra.mxu0 %v633_v5 }
  0x17   : > { %576 = vmatprep.subr.bf16.mxu0 %v634_v6 }
  0x1a   : > { %577 = vmatpush3.bf16.msra.mxu0 %v635_v7 }
  0x1b   : > { %578 = vmatprep.subr.bf16.mxu0 %v636_v8 }
  0x1e   : > { %579 = vmatpush3.bf16.msra.mxu0 %v637_v9 }
  0x1f   : > { %580 = vmatprep.subr.bf16.mxu0 %v638_v10 }
  0x22   : > { %581 = vmatpush3.bf16.msra.mxu0 %v639_v13 }
  0x23   : > { %582 = vmatprep.subr.bf16.mxu0 %v640_v15 }
  0x26   : > { %583 = vmatpush3.bf16.msra.mxu0 %v641_v16 }
  0x27   : > { %584 = vmatprep.subr.bf16.mxu0 %v642_v17 }
  0x2a   : > { %585 = vmatpush3.bf16.msra.mxu0 %v643_v18 }
  0x2d   : > { %400 = vmatmul.mubr.bf16.vlgmr.msra.gmra.mxu0 %v237_v19 }
  0x8f   : > { %v413_v31 = vpop.permute.xlu0 %412 }
  0xed   : > { %v586_v23 = vpop.f32.mrf.mxu0 }
  0xef   : > { %v587_v24 = vpop.f32.mrf.mxu0 }
  0xf0   : > { %v588_v25 = vadd.f32 %v587_v24, %v586_v23 }
  0xf1   : > { %v589_v26 = vpop.f32.mrf.mxu0 }
  0xf2   : > { %v408_v27 = vpack.c.bf16 %v588_v25, %v588_v25 }
  0xf3   : > { %v590_v28 = vpop.f32.mrf.mxu0 }
  0xf4   : > { %v421_v29 = vsel %vm419_vm1, %v408_v27, 0 }
  0xf5   : > { %595 = vmatpush3.bf16.msra.mxu1 %v421_v29 }
  0xf8   : > { %597 = vmatmul.mubr.msk.bf16.vlgmr.msra.gmra.mxu1 %vm415_vm2, %v407_v30 }
 0x1b8   : > { %v457_v32 = vpop.f32.mrf.mxu1 }
 0x1b9   : > { %v458_v33 = vadd.f32 %v457_v32, %v413_v31 }
 0x1ba   : > { %v598_v34 = vpop.f32.mrf.mxu1 }
 0x1bb   : > { %464 = vst.msk [vmem:[%s231_s14] sm:$0xff] %vm463_vm3, %v458_v33 }
 0x1bc   : > { %v460_v35 = vpop.f32.mrf.mxu1 }
 0x1be   : > { %v599_v36 = vpop.f32.mrf.mxu1 }
 0x1bf PF: > { %s14_s17 = sadd.s32 1, %s667_s17   ;;  %s796_s15 = smov %s663_s16 }
 0x1c0   : > { %p11_p5 = scmp.ge.s32.totalorder %s14_s17, 4   ;;  %s797_s16 = smov %s799_s18 }
 0x1c2   :  { %13 = sbr.rel (!%p11_p5) target bundleno = 2 (0x2), region = 66 }

</bundles_post_ra>
